<compile_context>
chip_gen: v7x
topology: tpu7x:2x2x1
jax: 0.10.0
libtpu: 0.0.40
codegen_flags: <defaults>
</compile_context>

<pallas_src>
import jax
import jax.numpy as jnp
from jax.experimental import pallas as pl
from jax.experimental.pallas import tpu as pltpu

BN_EPS = 1e-5
EMBED = 256                      # SegFormer decode head embedding dim
LANE = 128
TARGET_TM = 4096                 # row tile target (amortizes per-grid-step cost)
VMEM_LIMIT = 48 * 1024 * 1024    # explicit scoped-VMEM budget (headroom on v7x 64 MiB)


def _round_up(x, m):
    return (x + m - 1) // m * m


def _cdiv(a, b):
    return (a + b - 1) // b


def _pick_rows_tile(n):
    """Row tile (multiple of 128, capped at TARGET_TM) and padded row count.

    Prefers >= 2 grid steps so dimension_semantics=("parallel",) can shard the
    grid across both v7x TensorCores; irrelevant (but harmless) on v5e/v6e.
    """
    n_lane = _round_up(n, LANE)
    tm = min(TARGET_TM, n_lane)
    if n_lane // tm < 2 and n_lane > LANE:
        tm = _round_up(_cdiv(n_lane, 2), LANE)
    n_pad = _round_up(n_lane, tm)
    return tm, n_pad


def _pad_rows(x2d, n_pad):
    n = x2d.shape[0]
    if n_pad == n:
        return x2d
    return jnp.pad(x2d, ((0, n_pad - n), (0, 0)))


# --------------------------------------------------------------------------
# Kernel 1: per-stage 1x1 conv (+ folded BN bias) + ReLU, bf16 output
# --------------------------------------------------------------------------
def _stage_kernel(x_ref, w_ref, b_ref, o_ref):
    y = jnp.dot(x_ref[...], w_ref[...], preferred_element_type=jnp.float32)
    y = jnp.maximum(y + b_ref[...], 0.0)      # BN bias + ReLU in f32
    o_ref[...] = y.astype(o_ref.dtype)        # bf16 store: halves writeback traffic


def stage_proj(x2d_bf16, w_bf16, bias_f32, *, keep_padding=False):
    """x2d: (N, Cin) bf16, w: (Cin, 256) bf16, bias: (256,) f32.

    Returns (N, 256) bf16, or the padded (n_pad, 256) bf16 if keep_padding.
    """
    n, cin = x2d_bf16.shape
    cout = w_bf16.shape[1]
    tm, n_pad = _pick_rows_tile(n)
    xp = _pad_rows(x2d_bf16, n_pad)
    out = pl.pallas_call(
        _stage_kernel,
        out_shape=jax.ShapeDtypeStruct((n_pad, cout), jnp.bfloat16),
        grid_spec=pltpu.PrefetchScalarGridSpec(
            num_scalar_prefetch=0,
            grid=(n_pad // tm,),
            in_specs=[
                pl.BlockSpec((tm, cin), lambda i: (i, 0)),
                pl.BlockSpec((cin, cout), lambda i: (0, 0)),
                pl.BlockSpec((1, cout), lambda i: (0, 0)),
            ],
            out_specs=pl.BlockSpec((tm, cout), lambda i: (i, 0)),
        ),
        compiler_params=pltpu.CompilerParams(
            dimension_semantics=("parallel",),
            vmem_limit_bytes=VMEM_LIMIT),
    )(xp, w_bf16, bias_f32.reshape(1, cout))
    return out if keep_padding else out[:n]


# --------------------------------------------------------------------------
# Kernel 2: fused [concat -> 1024->256 MLP (+BN bias, ReLU) -> dropout(eval=id)
#                  -> seg_top 256->n_classes], lane-dense padded output
# --------------------------------------------------------------------------
def _head_kernel(f0_ref, f1_ref, f2_ref, f3_ref, wmlp_ref, bmlp_ref,
                 wtop_ref, btop_ref, o_ref):
    # concat + (1024 -> 256) matmul, accumulated in f32 without materializing
    # the 1024-channel concat tensor.
    acc = jnp.dot(f0_ref[...], wmlp_ref[0], preferred_element_type=jnp.float32)
    acc += jnp.dot(f1_ref[...], wmlp_ref[1], preferred_element_type=jnp.float32)
    acc += jnp.dot(f2_ref[...], wmlp_ref[2], preferred_element_type=jnp.float32)
    acc += jnp.dot(f3_ref[...], wmlp_ref[3], preferred_element_type=jnp.float32)
    y = jnp.maximum(acc + bmlp_ref[...], 0.0)           # BN bias + ReLU (f32)
    # Dropout2d is the identity in eval mode.
    logits = jnp.dot(y.astype(wtop_ref.dtype), wtop_ref[...],
                     preferred_element_type=jnp.float32) + btop_ref[...]
    o_ref[...] = logits.astype(o_ref.dtype)


def fused_head(feats, wmlp_split, bias_mlp, wtop_pad, btop_pad, *, tm):
    """feats: 4x (Npad, 256) bf16; wmlp_split: (4,256,256) bf16;
    wtop_pad: (256, Cpad) bf16. Returns (Npad, Cpad) f32 logits (padded)."""
    n_pad = feats[0].shape[0]
    cpad = wtop_pad.shape[1]
    feat_spec = pl.BlockSpec((tm, EMBED), lambda i: (i, 0))
    return pl.pallas_call(
        _head_kernel,
        out_shape=jax.ShapeDtypeStruct((n_pad, cpad), jnp.float32),
        grid_spec=pltpu.PrefetchScalarGridSpec(
            num_scalar_prefetch=0,
            grid=(n_pad // tm,),
            in_specs=[
                feat_spec, feat_spec, feat_spec, feat_spec,
                pl.BlockSpec((4, EMBED, EMBED), lambda i: (0, 0, 0)),
                pl.BlockSpec((1, EMBED), lambda i: (0, 0)),
                pl.BlockSpec((EMBED, cpad), lambda i: (0, 0)),
                pl.BlockSpec((1, cpad), lambda i: (0, 0)),
            ],
            out_specs=pl.BlockSpec((tm, cpad), lambda i: (i, 0)),
        ),
        compiler_params=pltpu.CompilerParams(
            dimension_semantics=("parallel",),
            vmem_limit_bytes=VMEM_LIMIT),
    )(*feats, wmlp_split, bias_mlp, wtop_pad, btop_pad)


# --------------------------------------------------------------------------
# Glue: bilinear resize (F.interpolate align_corners=False) as dense matmuls,
#       bf16 operands with f32 accumulation.
# --------------------------------------------------------------------------
def _interp_matrix(out_size, in_size):
    scale = in_size / out_size
    d = jnp.arange(out_size, dtype=jnp.float32)
    s = jnp.maximum((d + 0.5) * scale - 0.5, 0.0)
    i0 = jnp.minimum(jnp.floor(s).astype(jnp.int32), in_size - 1)
    i1 = jnp.minimum(i0 + 1, in_size - 1)
    lam = s - i0.astype(jnp.float32)
    m = (jax.nn.one_hot(i0, in_size, dtype=jnp.float32) * (1.0 - lam)[:, None]
         + jax.nn.one_hot(i1, in_size, dtype=jnp.float32) * lam[:, None])
    return m  # (out_size, in_size)


def _resize_bilinear_nhwc_bf16(x_bf16, out_h, out_w):
    b, h, w, c = x_bf16.shape
    if (h, w) == (out_h, out_w):
        return x_bf16
    mh = _interp_matrix(out_h, h).astype(jnp.bfloat16)
    mw = _interp_matrix(out_w, w).astype(jnp.bfloat16)
    y = jnp.einsum("Oh,bhwc->bOwc", mh, x_bf16,
                   preferred_element_type=jnp.float32).astype(jnp.bfloat16)
    y = jnp.einsum("Ow,bhwc->bhOc", mw, y,
                   preferred_element_type=jnp.float32).astype(jnp.bfloat16)
    return y


# --------------------------------------------------------------------------
# Parameters (deterministic init mirroring PyTorch _init_weights; BN folded)
# --------------------------------------------------------------------------
def init_params(key, in_channels, n_classes):
    keys = jax.random.split(key, 6)

    def conv_bn_module(k, cin, cout):
        # Conv2d(cin, cout, 1, bias=False), kaiming_normal_ fan_out relu:
        # std = sqrt(2 / (cout * 1 * 1))
        w = jax.random.normal(k, (cin, cout), jnp.float32) * jnp.sqrt(2.0 / cout)
        gamma = jnp.ones((cout,), jnp.float32)
        beta = jnp.zeros((cout,), jnp.float32)
        rmean = jnp.zeros((cout,), jnp.float32)
        rvar = jnp.ones((cout,), jnp.float32)
        scale = gamma / jnp.sqrt(rvar + BN_EPS)
        bias = beta - rmean * scale
        # Fold the BN scale into the conv weight (inference-mode fusion).
        return {"w": w * scale[None, :], "bias": bias}

    return {
        "mlp_layers": [conv_bn_module(keys[i], in_channels[i], EMBED) for i in range(4)],
        "mlp": conv_bn_module(keys[4], 4 * EMBED, EMBED),
        "seg_top": {
            "w": jax.random.normal(keys[5], (EMBED, n_classes), jnp.float32) * 0.01,
            "bias": jnp.zeros((n_classes,), jnp.float32),  # conv bias init to 0
        },
    }


# --------------------------------------------------------------------------
# SegFormerHead forward (wrapper): NCHW in, NCHW out
# --------------------------------------------------------------------------
def segformer_head_forward(xs_nchw, params):
    b = xs_nchw[0].shape[0]
    out_h, out_w = xs_nchw[0].shape[2], xs_nchw[0].shape[3]
    n = b * out_h * out_w
    n_classes = params["seg_top"]["w"].shape[1]
    tm, n_pad = _pick_rows_tile(n)

    # Stage projections (1x1 conv + BN + ReLU) in Pallas; bf16 resize in XLA.
    feats = []
    for i in range(4):
        # TODO(synk): accept/emit NHWC end-to-end if the caller allows, to drop
        # this NCHW<->NHWC transpose pair (full-tensor HBM passes).
        x = jnp.transpose(xs_nchw[i], (0, 2, 3, 1)).astype(jnp.bfloat16)  # NHWC bf16
        bh, hh, ww, cc = x.shape
        p = params["mlp_layers"][i]
        w_bf16 = p["w"].astype(jnp.bfloat16)
        if i == 0:
            # Stage 0 shares the head's N -> identical n_pad; keep the padded
            # rows and feed the head directly (no slice-then-repad round trip).
            feats.append(stage_proj(x.reshape(bh * hh * ww, cc), w_bf16,
                                    p["bias"], keep_padding=True))
        else:
            y = stage_proj(x.reshape(bh * hh * ww, cc), w_bf16, p["bias"])
            y = y.reshape(bh, hh, ww, EMBED)
            # TODO(synk): move this bilinear upsample inside the fused head
            # kernel (apply the interp matrices to the low-res features as
            # small bf16 matmuls) to cut the head's dominant input reads ~3x.
            y = _resize_bilinear_nhwc_bf16(y, out_h, out_w)
            feats.append(_pad_rows(y.reshape(n, EMBED), n_pad))

    # Fused concat + MLP + dropout(eval) + seg_top.
    p_mlp = params["mlp"]
    wmlp = p_mlp["w"].reshape(4, EMBED, EMBED).astype(jnp.bfloat16)
    bmlp = p_mlp["bias"].reshape(1, EMBED)

    p_top = params["seg_top"]
    cpad = _round_up(n_classes, LANE)                  # lane-dense output
    wtop = jnp.pad(p_top["w"], ((0, 0), (0, cpad - n_classes))).astype(jnp.bfloat16)
    btop = jnp.pad(p_top["bias"], (0, cpad - n_classes)).reshape(1, cpad)

    logits = fused_head(feats, wmlp, bmlp, wtop, btop, tm=tm)
    out = logits[:n, :n_classes].reshape(b, out_h, out_w, n_classes)
    return jnp.transpose(out, (0, 3, 1, 2))            # NCHW


# --------------------------------------------------------------------------
# Pure-JAX reference (identical bf16 quantization points, f32 accumulation)
# --------------------------------------------------------------------------
def _reference_forward(xs_nchw, params):
    b = xs_nchw[0].shape[0]
    out_h, out_w = xs_nchw[0].shape[2], xs_nchw[0].shape[3]
    feats = []
    for i in range(4):
        x = jnp.transpose(xs_nchw[i], (0, 2, 3, 1)).astype(jnp.bfloat16)
        bh, hh, ww, cc = x.shape
        p = params["mlp_layers"][i]
        y = jnp.dot(x.reshape(bh * hh * ww, cc), p["w"].astype(jnp.bfloat16),
                    preferred_element_type=jnp.float32) + p["bias"]
        y = jnp.maximum(y, 0.0).astype(jnp.bfloat16).reshape(bh, hh, ww, EMBED)
        if i != 0:
            y = _resize_bilinear_nhwc_bf16(y, out_h, out_w)
        feats.append(y)
    x = jnp.concatenate(feats, axis=-1)                      # (B, H, W, 1024) bf16
    p = params["mlp"]
    y = jnp.dot(x.reshape(-1, 4 * EMBED), p["w"].astype(jnp.bfloat16),
                preferred_element_type=jnp.float32) + p["bias"]
    y = jnp.maximum(y, 0.0).astype(jnp.bfloat16)
    p = params["seg_top"]
    out = jnp.dot(y, p["w"].astype(jnp.bfloat16),
                  preferred_element_type=jnp.float32) + p["bias"]
    out = out.reshape(b, out_h, out_w, -1)
    return jnp.transpose(out, (0, 3, 1, 2))


if __name__ == "__main__":
    key = jax.random.PRNGKey(0)
    in_channels = [4, 8, 16, 32]
    n_classes = 8
    B = 2
    spatial = [16, 8, 4, 2]  # xs[0] largest; others resized up to xs[0]

    k_params, *k_inputs = jax.random.split(key, 5)
    params = init_params(k_params, in_channels, n_classes)
    xs = [
        jax.random.normal(k_inputs[i], (B, in_channels[i], spatial[i], spatial[i]),
                          jnp.float32)
        for i in range(4)
    ]

    out = jax.block_until_ready(segformer_head_forward(xs, params))
    assert out.shape == (B, n_classes, spatial[0], spatial[0]), out.shape

    ref = jax.block_until_ready(_reference_forward(xs, params))
    assert jnp.allclose(out, ref, atol=2e-3, rtol=2e-3), "mismatch vs reference"

    print("KERNEL_OK")
</pallas_src>

<mosaic_0001>
module attributes {stable_mosaic.version = 11 : i64} {
  func.func @_stage_kernel(%arg0: i32, %arg1: memref<256x4xbf16, #tpu.memory_space<vmem>>, %arg2: memref<4x256xbf16, #tpu.memory_space<vmem>>, %arg3: memref<1x256xf32, #tpu.memory_space<vmem>>, %arg4: memref<256x256xbf16, #tpu.memory_space<vmem>>) attributes {dimension_semantics = [#tpu.dimension_semantics<parallel>], iteration_bounds = array<i64: 2>, scalar_prefetch = 0 : i64, scratch_operands = 0 : i64, tpu.core_type = #tpu.core_type<tc>, window_params = [{transform_indices = @transform_0, window_bounds = array<i64: 256, 4>}, {pipeline_mode = #tpu.pipeline_mode<synchronous>, transform_indices = @transform_1, window_bounds = array<i64: 4, 256>}, {pipeline_mode = #tpu.pipeline_mode<synchronous>, transform_indices = @transform_2, window_bounds = array<i64: 1, 256>}, {transform_indices = @transform_3, window_bounds = array<i64: 256, 256>}]} {
    %c0 = arith.constant 0 : index
    %c0_0 = arith.constant 0 : index
    %0 = vector.load %arg1[%c0, %c0_0] : memref<256x4xbf16, #tpu.memory_space<vmem>>, vector<256x4xbf16>
    %c0_1 = arith.constant 0 : index
    %c0_2 = arith.constant 0 : index
    %1 = vector.load %arg2[%c0_1, %c0_2] : memref<4x256xbf16, #tpu.memory_space<vmem>>, vector<4x256xbf16>
    %cst = arith.constant dense<0.000000e+00> : vector<256x256xf32>
    %2 = tpu.matmul %0, %1, %cst {dimension_numbers = #tpu.dot_dimension_numbers<[1], [0], [0], [1], [0, 0, 1, 1], [], []>} : vector<256x4xbf16>, vector<4x256xbf16>, vector<256x256xf32> -> vector<256x256xf32>
    %c0_3 = arith.constant 0 : index
    %c0_4 = arith.constant 0 : index
    %3 = vector.load %arg3[%c0_3, %c0_4] : memref<1x256xf32, #tpu.memory_space<vmem>>, vector<1x256xf32>
    %4 = vector.broadcast %3 : vector<1x256xf32> to vector<256x256xf32>
    %5 = arith.addf %2, %4 : vector<256x256xf32>
    %cst_5 = arith.constant 0.000000e+00 : f32
    %6 = vector.broadcast %cst_5 : f32 to vector<256x256xf32>
    %7 = arith.maximumf %5, %6 : vector<256x256xf32>
    %8 = arith.truncf %7 : vector<256x256xf32> to vector<256x256xbf16>
    %c0_6 = arith.constant 0 : index
    %c0_7 = arith.constant 0 : index
    %9 = vector.load %arg4[%c0_6, %c0_7] : memref<256x256xbf16, #tpu.memory_space<vmem>>, vector<256x256xbf16>
    tpu.vector_store %arg4[%c0_6, %c0_7], %8 {strides = array<i32>} : memref<256x256xbf16, #tpu.memory_space<vmem>>, vector<256x256xbf16>,
    return
  }
  func.func @transform_0(%arg0: i32) -> (i32, i32) {
    %c0_i32 = arith.constant 0 : i32
    %c0_i32_0 = arith.constant 0 : i32
    return %arg0, %c0_i32 : i32, i32
  }
  func.func @transform_1(%arg0: i32) -> (i32, i32) {
    %c0_i32 = arith.constant 0 : i32
    %c0_i32_0 = arith.constant 0 : i32
    %c0_i32_1 = arith.constant 0 : i32
    return %c0_i32, %c0_i32_0 : i32, i32
  }
  func.func @transform_2(%arg0: i32) -> (i32, i32) {
    %c0_i32 = arith.constant 0 : i32
    %c0_i32_0 = arith.constant 0 : i32
    %c0_i32_1 = arith.constant 0 : i32
    return %c0_i32, %c0_i32_0 : i32, i32
  }
  func.func @transform_3(%arg0: i32) -> (i32, i32) {
    %c0_i32 = arith.constant 0 : i32
    %c0_i32_0 = arith.constant 0 : i32
    return %arg0, %c0_i32 : i32, i32
  }
}

</mosaic_0001>

<bundles_post_ra>
// kernel: tpu_custom_call.1
= control target key start
LH: loop header
LB: loop body
LE: loop exit
PB: predicated region body
PF: predicated region fallthrough
CT: control target
= control target key end

     0   :  { %8 = vsyncpa [#allocation3], 0  ;;  %s1431_s0 = inlined_call_operand.vmem [shape: bf16[512,4], index: 0, kind: input, shape index: {}]   ;;  %s1432_s1 = inlined_call_operand.vmem [shape: bf16[4,256], index: 1, kind: input, shape index: {}]   ;;  %s1433_s2 = inlined_call_operand.vmem [shape: f32[1,256], index: 2, kind: input, shape index: {}]   ;;  %s1434_s3 = inlined_call_operand.hbm [shape: bf16[512,256], index: 3, kind: output, shape index: {}]  }
   0x1   :  { %10 = vsyncpa [#allocation3 + $0x1], 0  ;;  %s1182_s12 = smov 0   ;;  %s1184_s13 = smov 0  }
   0x2   :  { %s1186_s14 = smov 0   ;;  %s1188_s15 = smov 0  }
   0x3 LB: > { %s1203_s16 = sadd.s32 4294967295, %s1156_s15   ;;  %s921_s17 = sadd.s32 4294967294, %s1156_s15   ;;  %s1156_s15 = sphi %s1188_s15, %s1440_s15   ;;  %s1152_s14 = sphi %s1186_s14, %s1439_s14   ;;  %s1148_s13 = sphi %s1184_s13, %s1438_s13   ;;  %s1144_s12 = sphi %s1182_s12, %s1437_s12  }
   0x4   : > { %s1207_s18 = sadd.s32 1, %s1156_s15   ;;  %s91_s19 = sadd.s32 1, %s1152_s14 }
   0x5   : > { %s88_s20 = ssub.s32 %s1156_s15, %s1207_s18  ;;  %p101_p0 = scmp.ne.s32.totalorder %s1152_s14, %s1148_s13 }
   0x6   : > { %p89_p1 = scmp.eq.s32.totalorder %s88_s20, 0  ;;  %p102_p2 = scmp.eq.s32.totalorder %s1203_s16, 1 }
   0x7   : > { %p107_p3 = scmp.ne.s32.totalorder %s1148_s13, %s1144_s12  ;;  %p108_p4 = scmp.eq.s32.totalorder %s921_s17, 1 }
   0x8   : > { %s1218_s21 = scalar_select %p89_p1, %s1152_s14, %s91_s19  }
   0x9   : > { %p1220_p5 = por %p102_p2, %p101_p0  ;;  %p1224_p6 = por %p108_p4, %p107_p3 }
   0xa   : > { %p924_p7 = scmp.ge.s32.totalorder %s1156_s15, 1  ;;  %p141_p8 = scmp.lt.s32.totalorder %s1156_s15, 3 }
   0xc   : > { %p142_p9 = pnand %p924_p7, %p141_p8 }
   0xd   : > { %v944_v0 = vld.sshfl [vmem:[%s1432_s1] sm:$0x33 pattern:$0x76325410] (!%p142_p9)  ;;  %vm356_vm0 = vcmask (!%p142_p9), 1041408   ;;  %v1158_v3 = vmov (!%p142_p9), 0   ;;  %v208_v20 = vlaneseq (!%p142_p9) }
   0xe   : > { %145 = sbr.rel (%p142_p9) target bundleno = 318 (0x13e), region = 32  ;;  %v306_v1 = vcombine.high (!%p142_p9), %v944_v0, %v944_v0  ;;  %v358_v2 = vsel (!%p142_p9), %vm356_vm0, %v944_v0, 0  ;;  %395 = vmatprep.mubr.bf16.mxu0 (!%p142_p9), %v1158_v3  ;;  %475 = vmatprep.mubr.bf16.mxu1 (!%p142_p9), %v1158_v3  ;;  %s926_s26 = sshll.u32 (!%p142_p9), %s1203_s16, 5  ;;  %vm307_vm1 = vcmask (!%p142_p9), 31744   ;;  %v206_v23 = vld [vmem:[%s1433_s2] sm:$0x3] (!%p142_p9) }
   0xf   : > { %p166_p10 = scmp.lt.s32.totalorder (!%p142_p9), %s926_s26, 63  ;;  %v209_v21 = vshrl.u32 (!%p142_p9), %v208_v20, 7  ;;  %s162_s6 = sand.u32 (!%p142_p9), 1, %s1148_s13  }
  0x10   : > { %945 = vmatprep.subr.msk.bf16.mxu0 (!%p142_p9), %vm356_vm0, %v306_v1  ;;  %1034 = vmatprep.subr.msk.bf16.mxu1 (!%p142_p9), %vm356_vm0, %v306_v1  ;;  %s925_s7 = sshll.u32 (!%p142_p9), %s162_s6, 8  ;;  %s1033_s9 = sshll.u32 (!%p142_p9), %s1203_s16, 12 }
  0x11   : > { %364 = vmatpush1.bf16.msra.mxu0 (!%p142_p9), %v358_v2  ;;  %1035 = vmatpush1.bf16.msra.mxu1 (!%p142_p9), %v358_v2  ;;  %v210_v22 = vsub.s32 (!%p142_p9), 0, %v209_v21  ;;  %v214_v24 = vsub.s32 (!%p142_p9), 1, %v209_v21  ;;  %s1289_s8 = scalar_lea.vmem (!%p142_p9), [#allocation2], %s925_s7  ;;  %s1381_s19 = scalar_lea.hbm (!%p142_p9), %s1434_s3, %s1033_s9 }
  0x12   : > { %s859_s10 = sshll.u32 (!%p142_p9), %s1289_s8, 4  ;;  %s1390_s16 = scalar_lea.sflag (!%p142_p9), [#allocation3], %s162_s6  ;;  %s1383_s10 = int_to_ptr.vmem [resolvable:$true] %s859_s10 }
  0x13   : > { %v1274_v25 = vrot.slane (!%p142_p9), %v206_v23, %v210_v22  ;;  %v1276_v26 = vrot.slane (!%p142_p9), %v206_v23, %v214_v24  ;;  %s1094_s20 = scalar_lea.vmem (!%p142_p9), %s1383_s10, 4096  ;;  %s1159_s24 = smov (!%p142_p9), [#allocation2]  }
  0x14   : > { %p1095_p11 = scmp.ne.s32.totalorder (!%p142_p9), %s1383_s10, %s1094_s20  ;;  %s1098_s25 = sshll.u32 (!%p142_p9), %s1159_s24, 4  ;;  %s1099_s25 = int_to_ptr.vmem [resolvable:$false] %s1098_s25 }
  0x15   : > { %s1442_s26 = smov (!%p166_p10, %s926_s26), 63  ;;  %p1101_p0 = scmp.lt.s32.totalorder %s1383_s10, %s1099_s25 }
  0x16   : > { %s927_s27 = sshll.u32 %s1442_s26, 2  ;;  %p1096_p12 = pnand %p1095_p11, %p1220_p5 }
  0x17   : > { %s1237_s30 = scalar_lea.vmem %s1431_s0, %s927_s27  ;;  %s1100_s26 = scalar_lea.vmem %s1099_s25, 8192 }
  0x18   : > { %v1078_v4 = vld [vmem:[%s1237_s30] sm:$0xff]   ;;  %v1080_v6 = vld [vmem:[%s1237_s30 + $0x8] sm:$0xff]   ;;  %v1082_v8 = vld [vmem:[%s1237_s30 + $0x10] sm:$0xff]   ;;  %p1097_p13 = pneg %p1096_p12  ;;  %p1102_p1 = scmp.lt.s32.totalorder %s1100_s26, %s1094_s20 }
  0x19   : > { %v1079_v5 = vld [vmem:[%s1237_s30 + $0x40] sm:$0xff]   ;;  %946 = vmatmul.mubr.msk.bf16.vlgmr.msra.gmra.mrb[0].mxu0 %vm307_vm1, %v1078_v4  ;;  %v1081_v7 = vld [vmem:[%s1237_s30 + $0x48] sm:$0xff]   ;;  %v1083_v9 = vld [vmem:[%s1237_s30 + $0x50] sm:$0xff]  }
  0x1a   : > { %954 = vmatmul.mubr.msk.bf16.vlgmr.msra.gmra.mrb[0].mxu1 %vm307_vm1, %v1079_v5  ;;  %405 = vmatprep.mubr.bf16.mxu0 %v1158_v3  ;;  %v1084_v10 = vld [vmem:[%s1237_s30 + $0x18] sm:$0xff]   ;;  %v1086_v12 = vld [vmem:[%s1237_s30 + $0x20] sm:$0xff]   ;;  %v1088_v14 = vld [vmem:[%s1237_s30 + $0x28] sm:$0xff]   ;;  %p1103_p2 = por %p1102_p1, %p1101_p0 }
  0x1b   : > { %485 = vmatprep.mubr.bf16.mxu1 %v1158_v3  ;;  %v1085_v11 = vld [vmem:[%s1237_s30 + $0x58] sm:$0xff]   ;;  %v1087_v13 = vld [vmem:[%s1237_s30 + $0x60] sm:$0xff]   ;;  %v1089_v15 = vld [vmem:[%s1237_s30 + $0x68] sm:$0xff]  }
  0x1c   : > { %v1090_v16 = vld [vmem:[%s1237_s30 + $0x30] sm:$0xff]   ;;  %v1092_v18 = vld [vmem:[%s1237_s30 + $0x38] sm:$0xff]   ;;  %p1104_p3 = pnand %p1103_p2, %p1097_p13 }
  0x1d   : > { %v1091_v17 = vld [vmem:[%s1237_s30 + $0x70] sm:$0xff]   ;;  %v1093_v19 = vld [vmem:[%s1237_s30 + $0x78] sm:$0xff]  }
  0x21   : > { %947 = vmatmul.mubr.msk.bf16.gmra.mrb[4].mxu0 %vm307_vm1, %v1080_v6 }
  0x22   : > { %955 = vmatmul.mubr.msk.bf16.gmra.mrb[4].mxu1 %vm307_vm1, %v1081_v7  ;;  %415 = vmatprep.mubr.bf16.mxu0 %v1158_v3 }
  0x23   : > { %495 = vmatprep.mubr.bf16.mxu1 %v1158_v3 }
  0x29   : > { %948 = vmatmul.mubr.msk.bf16.gmra.mrb[8].mxu0 %vm307_vm1, %v1082_v8 }
  0x2a   : > { %956 = vmatmul.mubr.msk.bf16.gmra.mrb[8].mxu1 %vm307_vm1, %v1083_v9  ;;  %425 = vmatprep.mubr.bf16.mxu0 %v1158_v3 }
  0x2b   : > { %505 = vmatprep.mubr.bf16.mxu1 %v1158_v3 }
  0x31   : > { %949 = vmatmul.mubr.msk.bf16.gmra.mrb[12].mxu0 %vm307_vm1, %v1084_v10 }
  0x32   : > { %957 = vmatmul.mubr.msk.bf16.gmra.mrb[12].mxu1 %vm307_vm1, %v1085_v11  ;;  %435 = vmatprep.mubr.bf16.mxu0 %v1158_v3 }
  0x33   : > { %515 = vmatprep.mubr.bf16.mxu1 %v1158_v3 }
  0x39   : > { %950 = vmatmul.mubr.msk.bf16.gmra.mrb[16].mxu0 %vm307_vm1, %v1086_v12 }
  0x3a   : > { %958 = vmatmul.mubr.msk.bf16.gmra.mrb[16].mxu1 %vm307_vm1, %v1087_v13  ;;  %445 = vmatprep.mubr.bf16.mxu0 %v1158_v3 }
  0x3b   : > { %525 = vmatprep.mubr.bf16.mxu1 %v1158_v3 }
  0x41   : > { %951 = vmatmul.mubr.msk.bf16.gmra.mrb[20].mxu0 %vm307_vm1, %v1088_v14 }
  0x42   : > { %959 = vmatmul.mubr.msk.bf16.gmra.mrb[20].mxu1 %vm307_vm1, %v1089_v15  ;;  %455 = vmatprep.mubr.bf16.mxu0 %v1158_v3 }
  0x43   : > { %535 = vmatprep.mubr.bf16.mxu1 %v1158_v3 }
  0x49   : > { %952 = vmatmul.mubr.msk.bf16.gmra.mrb[24].mxu0 %vm307_vm1, %v1090_v16 }
  0x4a   : > { %960 = vmatmul.mubr.msk.bf16.gmra.mrb[24].mxu1 %vm307_vm1, %v1091_v17  ;;  %465 = vmatprep.mubr.bf16.mxu0 %v1158_v3 }
  0x4b   : > { %545 = vmatprep.mubr.bf16.mxu1 %v1158_v3 }
  0x51   : > { %953 = vmatmul.mubr.msk.bf16.gmra.mrb[28].mxu0 %vm307_vm1, %v1092_v18 }
  0x52   : > { %961 = vmatmul.mubr.msk.bf16.gmra.mrb[28].mxu1 %vm307_vm1, %v1093_v19 }
  0xec   : > { %v397_v27 = vpop.f32.mrb[0].mxu0 }
  0xed   : > { %v398_v28 = vadd.f32 %v397_v27, %v1274_v25  ;;  %v477_v29 = vpop.f32.mrb[0].mxu1  ;;  %v399_v30 = vpop.f32.mrb[1].mxu0 }
  0xee   : > { %v478_v31 = vadd.f32 %v477_v29, %v1274_v25  ;;  %v400_v32 = vadd.f32 %v399_v30, %v1276_v26  ;;  %v479_v33 = vpop.f32.mrb[1].mxu1  ;;  %v401_v34 = vpop.f32.mrb[2].mxu0 }
  0xef   : > { %v556_v35 = vmax.f32 %v398_v28, 0.0  ;;  %v480_v36 = vadd.f32 %v479_v33, %v1276_v26  ;;  %v402_v37 = vadd.f32 %v401_v34, %v1274_v25  ;;  %v481_v38 = vpop.f32.mrb[2].mxu1  ;;  %v403_v39 = vpop.f32.mrb[3].mxu0 }
  0xf0   : > { %v588_v40 = vmax.f32 %v478_v31, 0.0  ;;  %v557_v41 = vmax.f32 %v400_v32, 0.0  ;;  %v482_v42 = vadd.f32 %v481_v38, %v1274_v25  ;;  %v404_v43 = vadd.f32 %v403_v39, %v1276_v26  ;;  %v483_v44 = vpop.f32.mrb[3].mxu1 }
  0xf1   : > { %v589_v45 = vmax.f32 %v480_v36, 0.0  ;;  %v558_v46 = vmax.f32 %v402_v37, 0.0  ;;  %v484_v47 = vadd.f32 %v483_v44, %v1276_v26 }
  0xf2   : > { %v1000_v48 = vpack.c.bf16 %v557_v41, %v556_v35  ;;  %v590_v49 = vmax.f32 %v482_v42, 0.0  ;;  %v559_v50 = vmax.f32 %v404_v43, 0.0 }
  0xf3   : > { %v1016_v51 = vpack.c.bf16 %v589_v45, %v588_v40  ;;  %v591_v52 = vmax.f32 %v484_v47, 0.0 }
  0xf4   : > { %812 = vst [vmem:[%s1289_s8] sm:$0xff] %v1000_v48  ;;  %v1001_v53 = vpack.c.bf16 %v559_v50, %v558_v46  ;;  %v407_v54 = vpop.f32.mrb[4].mxu0 }
  0xf5   : > { %828 = vst [vmem:[%s1289_s8 + $0x80] sm:$0xff] %v1016_v51  ;;  %v1017_v55 = vpack.c.bf16 %v591_v52, %v590_v49  ;;  %v408_v56 = vadd.f32 %v407_v54, %v1274_v25  ;;  %v487_v57 = vpop.f32.mrb[4].mxu1  ;;  %v409_v58 = vpop.f32.mrb[5].mxu0 }
  0xf6   : > { %813 = vst [vmem:[%s1289_s8 + $0x8] sm:$0xff] %v1001_v53  ;;  %v488_v59 = vadd.f32 %v487_v57, %v1274_v25  ;;  %v410_v60 = vadd.f32 %v409_v58, %v1276_v26  ;;  %v489_v61 = vpop.f32.mrb[5].mxu1  ;;  %v411_v62 = vpop.f32.mrb[6].mxu0 }
  0xf7   : > { %829 = vst [vmem:[%s1289_s8 + $0x88] sm:$0xff] %v1017_v55  ;;  %v560_v63 = vmax.f32 %v408_v56, 0.0  ;;  %v490_v0 = vadd.f32 %v489_v61, %v1276_v26  ;;  %v412_v1 = vadd.f32 %v411_v62, %v1274_v25  ;;  %v491_v2 = vpop.f32.mrb[6].mxu1  ;;  %v413_v3 = vpop.f32.mrb[7].mxu0 }
  0xf8   : > { %v592_v4 = vmax.f32 %v488_v59, 0.0  ;;  %v561_v5 = vmax.f32 %v410_v60, 0.0  ;;  %v492_v6 = vadd.f32 %v491_v2, %v1274_v25  ;;  %v414_v7 = vadd.f32 %v413_v3, %v1276_v26  ;;  %v493_v8 = vpop.f32.mrb[7].mxu1 }
  0xf9   : > { %v593_v9 = vmax.f32 %v490_v0, 0.0  ;;  %v562_v10 = vmax.f32 %v412_v1, 0.0  ;;  %v494_v11 = vadd.f32 %v493_v8, %v1276_v26 }
  0xfa   : > { %v1002_v12 = vpack.c.bf16 %v561_v5, %v560_v63  ;;  %v594_v13 = vmax.f32 %v492_v6, 0.0  ;;  %v563_v14 = vmax.f32 %v414_v7, 0.0 }
  0xfb   : > { %v1018_v15 = vpack.c.bf16 %v593_v9, %v592_v4  ;;  %v595_v16 = vmax.f32 %v494_v11, 0.0 }
  0xfc   : > { %814 = vst [vmem:[%s1289_s8 + $0x10] sm:$0xff] %v1002_v12  ;;  %v1003_v17 = vpack.c.bf16 %v563_v14, %v562_v10  ;;  %v417_v18 = vpop.f32.mrb[8].mxu0 }
  0xfd   : > { %830 = vst [vmem:[%s1289_s8 + $0x90] sm:$0xff] %v1018_v15  ;;  %v1019_v19 = vpack.c.bf16 %v595_v16, %v594_v13  ;;  %v418_v20 = vadd.f32 %v417_v18, %v1274_v25  ;;  %v497_v21 = vpop.f32.mrb[8].mxu1  ;;  %v419_v22 = vpop.f32.mrb[9].mxu0 }
  0xfe   : > { %815 = vst [vmem:[%s1289_s8 + $0x18] sm:$0xff] %v1003_v17  ;;  %v498_v23 = vadd.f32 %v497_v21, %v1274_v25  ;;  %v420_v24 = vadd.f32 %v419_v22, %v1276_v26  ;;  %v499_v27 = vpop.f32.mrb[9].mxu1  ;;  %v421_v28 = vpop.f32.mrb[10].mxu0 }
  0xff   : > { %831 = vst [vmem:[%s1289_s8 + $0x98] sm:$0xff] %v1019_v19  ;;  %v564_v29 = vmax.f32 %v418_v20, 0.0  ;;  %v500_v30 = vadd.f32 %v499_v27, %v1276_v26  ;;  %v422_v31 = vadd.f32 %v421_v28, %v1274_v25  ;;  %v501_v32 = vpop.f32.mrb[10].mxu1  ;;  %v423_v33 = vpop.f32.mrb[11].mxu0 }
 0x100   : > { %v596_v34 = vmax.f32 %v498_v23, 0.0  ;;  %v565_v35 = vmax.f32 %v420_v24, 0.0  ;;  %v502_v36 = vadd.f32 %v501_v32, %v1274_v25  ;;  %v424_v37 = vadd.f32 %v423_v33, %v1276_v26  ;;  %v503_v38 = vpop.f32.mrb[11].mxu1 }
 0x101   : > { %v597_v39 = vmax.f32 %v500_v30, 0.0  ;;  %v566_v40 = vmax.f32 %v422_v31, 0.0  ;;  %v504_v41 = vadd.f32 %v503_v38, %v1276_v26 }
 0x102   : > { %v1004_v42 = vpack.c.bf16 %v565_v35, %v564_v29  ;;  %v598_v43 = vmax.f32 %v502_v36, 0.0  ;;  %v567_v44 = vmax.f32 %v424_v37, 0.0 }
 0x103   : > { %v1020_v45 = vpack.c.bf16 %v597_v39, %v596_v34  ;;  %v599_v46 = vmax.f32 %v504_v41, 0.0 }
 0x104   : > { %816 = vst [vmem:[%s1289_s8 + $0x20] sm:$0xff] %v1004_v42  ;;  %v1005_v47 = vpack.c.bf16 %v567_v44, %v566_v40  ;;  %v427_v48 = vpop.f32.mrb[12].mxu0 }
 0x105   : > { %832 = vst [vmem:[%s1289_s8 + $0xa0] sm:$0xff] %v1020_v45  ;;  %v1021_v49 = vpack.c.bf16 %v599_v46, %v598_v43  ;;  %v428_v50 = vadd.f32 %v427_v48, %v1274_v25  ;;  %v507_v51 = vpop.f32.mrb[12].mxu1  ;;  %v429_v52 = vpop.f32.mrb[13].mxu0 }
 0x106   : > { %817 = vst [vmem:[%s1289_s8 + $0x28] sm:$0xff] %v1005_v47  ;;  %v508_v53 = vadd.f32 %v507_v51, %v1274_v25  ;;  %v430_v54 = vadd.f32 %v429_v52, %v1276_v26  ;;  %v509_v55 = vpop.f32.mrb[13].mxu1  ;;  %v431_v56 = vpop.f32.mrb[14].mxu0 }
 0x107   : > { %833 = vst [vmem:[%s1289_s8 + $0xa8] sm:$0xff] %v1021_v49  ;;  %v568_v57 = vmax.f32 %v428_v50, 0.0  ;;  %v510_v58 = vadd.f32 %v509_v55, %v1276_v26  ;;  %v432_v59 = vadd.f32 %v431_v56, %v1274_v25  ;;  %v511_v60 = vpop.f32.mrb[14].mxu1  ;;  %v433_v61 = vpop.f32.mrb[15].mxu0 }
 0x108   : > { %v600_v62 = vmax.f32 %v508_v53, 0.0  ;;  %v569_v63 = vmax.f32 %v430_v54, 0.0  ;;  %v512_v0 = vadd.f32 %v511_v60, %v1274_v25  ;;  %v434_v1 = vadd.f32 %v433_v61, %v1276_v26  ;;  %v513_v2 = vpop.f32.mrb[15].mxu1 }
 0x109   : > { %v601_v3 = vmax.f32 %v510_v58, 0.0  ;;  %v570_v4 = vmax.f32 %v432_v59, 0.0  ;;  %v514_v5 = vadd.f32 %v513_v2, %v1276_v26 }
 0x10a   : > { %v1006_v6 = vpack.c.bf16 %v569_v63, %v568_v57  ;;  %v602_v7 = vmax.f32 %v512_v0, 0.0  ;;  %v571_v8 = vmax.f32 %v434_v1, 0.0 }
 0x10b   : > { %v1022_v9 = vpack.c.bf16 %v601_v3, %v600_v62  ;;  %v603_v10 = vmax.f32 %v514_v5, 0.0 }
 0x10c   : > { %818 = vst [vmem:[%s1289_s8 + $0x30] sm:$0xff] %v1006_v6  ;;  %v1007_v11 = vpack.c.bf16 %v571_v8, %v570_v4  ;;  %v437_v12 = vpop.f32.mrb[16].mxu0 }
 0x10d   : > { %834 = vst [vmem:[%s1289_s8 + $0xb0] sm:$0xff] %v1022_v9  ;;  %v1023_v13 = vpack.c.bf16 %v603_v10, %v602_v7  ;;  %v438_v14 = vadd.f32 %v437_v12, %v1274_v25  ;;  %v517_v15 = vpop.f32.mrb[16].mxu1  ;;  %v439_v16 = vpop.f32.mrb[17].mxu0 }
 0x10e   : > { %819 = vst [vmem:[%s1289_s8 + $0x38] sm:$0xff] %v1007_v11  ;;  %v518_v17 = vadd.f32 %v517_v15, %v1274_v25  ;;  %v440_v18 = vadd.f32 %v439_v16, %v1276_v26  ;;  %v519_v19 = vpop.f32.mrb[17].mxu1  ;;  %v441_v20 = vpop.f32.mrb[18].mxu0 }
 0x10f   : > { %835 = vst [vmem:[%s1289_s8 + $0xb8] sm:$0xff] %v1023_v13  ;;  %v572_v21 = vmax.f32 %v438_v14, 0.0  ;;  %v520_v22 = vadd.f32 %v519_v19, %v1276_v26  ;;  %v442_v23 = vadd.f32 %v441_v20, %v1274_v25  ;;  %v521_v24 = vpop.f32.mrb[18].mxu1  ;;  %v443_v27 = vpop.f32.mrb[19].mxu0 }
 0x110   : > { %v604_v28 = vmax.f32 %v518_v17, 0.0  ;;  %v573_v29 = vmax.f32 %v440_v18, 0.0  ;;  %v522_v30 = vadd.f32 %v521_v24, %v1274_v25  ;;  %v444_v31 = vadd.f32 %v443_v27, %v1276_v26  ;;  %v523_v32 = vpop.f32.mrb[19].mxu1 }
 0x111   : > { %v605_v33 = vmax.f32 %v520_v22, 0.0  ;;  %v574_v34 = vmax.f32 %v442_v23, 0.0  ;;  %v524_v35 = vadd.f32 %v523_v32, %v1276_v26 }
 0x112   : > { %v1008_v36 = vpack.c.bf16 %v573_v29, %v572_v21  ;;  %v606_v37 = vmax.f32 %v522_v30, 0.0  ;;  %v575_v38 = vmax.f32 %v444_v31, 0.0 }
 0x113   : > { %v1024_v39 = vpack.c.bf16 %v605_v33, %v604_v28  ;;  %v607_v40 = vmax.f32 %v524_v35, 0.0 }
 0x114   : > { %820 = vst [vmem:[%s1289_s8 + $0x40] sm:$0xff] %v1008_v36  ;;  %v1009_v41 = vpack.c.bf16 %v575_v38, %v574_v34  ;;  %v447_v42 = vpop.f32.mrb[20].mxu0 }
 0x115   : > { %836 = vst [vmem:[%s1289_s8 + $0xc0] sm:$0xff] %v1024_v39  ;;  %v1025_v43 = vpack.c.bf16 %v607_v40, %v606_v37  ;;  %v448_v44 = vadd.f32 %v447_v42, %v1274_v25  ;;  %v527_v45 = vpop.f32.mrb[20].mxu1  ;;  %v449_v46 = vpop.f32.mrb[21].mxu0 }
 0x116   : > { %821 = vst [vmem:[%s1289_s8 + $0x48] sm:$0xff] %v1009_v41  ;;  %v528_v47 = vadd.f32 %v527_v45, %v1274_v25  ;;  %v450_v48 = vadd.f32 %v449_v46, %v1276_v26  ;;  %v529_v49 = vpop.f32.mrb[21].mxu1  ;;  %v451_v50 = vpop.f32.mrb[22].mxu0 }
 0x117   : > { %837 = vst [vmem:[%s1289_s8 + $0xc8] sm:$0xff] %v1025_v43  ;;  %v576_v51 = vmax.f32 %v448_v44, 0.0  ;;  %v530_v52 = vadd.f32 %v529_v49, %v1276_v26  ;;  %v452_v53 = vadd.f32 %v451_v50, %v1274_v25  ;;  %v531_v54 = vpop.f32.mrb[22].mxu1  ;;  %v453_v55 = vpop.f32.mrb[23].mxu0 }
 0x118   : > { %v608_v56 = vmax.f32 %v528_v47, 0.0  ;;  %v577_v57 = vmax.f32 %v450_v48, 0.0  ;;  %v532_v58 = vadd.f32 %v531_v54, %v1274_v25  ;;  %v454_v59 = vadd.f32 %v453_v55, %v1276_v26  ;;  %v533_v60 = vpop.f32.mrb[23].mxu1 }
 0x119   : > { %v609_v61 = vmax.f32 %v530_v52, 0.0  ;;  %v578_v62 = vmax.f32 %v452_v53, 0.0  ;;  %v534_v63 = vadd.f32 %v533_v60, %v1276_v26 }
 0x11a   : > { %v1010_v0 = vpack.c.bf16 %v577_v57, %v576_v51  ;;  %v610_v1 = vmax.f32 %v532_v58, 0.0  ;;  %v579_v2 = vmax.f32 %v454_v59, 0.0 }
 0x11b   : > { %v1026_v3 = vpack.c.bf16 %v609_v61, %v608_v56  ;;  %v611_v4 = vmax.f32 %v534_v63, 0.0 }
 0x11c   : > { %822 = vst [vmem:[%s1289_s8 + $0x50] sm:$0xff] %v1010_v0  ;;  %v1011_v5 = vpack.c.bf16 %v579_v2, %v578_v62  ;;  %v457_v6 = vpop.f32.mrb[24].mxu0 }
 0x11d   : > { %838 = vst [vmem:[%s1289_s8 + $0xd0] sm:$0xff] %v1026_v3  ;;  %v1027_v7 = vpack.c.bf16 %v611_v4, %v610_v1  ;;  %v458_v8 = vadd.f32 %v457_v6, %v1274_v25  ;;  %v537_v9 = vpop.f32.mrb[24].mxu1  ;;  %v459_v10 = vpop.f32.mrb[25].mxu0 }
 0x11e   : > { %823 = vst [vmem:[%s1289_s8 + $0x58] sm:$0xff] %v1011_v5  ;;  %v538_v11 = vadd.f32 %v537_v9, %v1274_v25  ;;  %v460_v12 = vadd.f32 %v459_v10, %v1276_v26  ;;  %v539_v13 = vpop.f32.mrb[25].mxu1  ;;  %v461_v14 = vpop.f32.mrb[26].mxu0 }
 0x11f   : > { %839 = vst [vmem:[%s1289_s8 + $0xd8] sm:$0xff] %v1027_v7  ;;  %v580_v15 = vmax.f32 %v458_v8, 0.0  ;;  %v540_v16 = vadd.f32 %v539_v13, %v1276_v26  ;;  %v462_v17 = vadd.f32 %v461_v14, %v1274_v25  ;;  %v541_v18 = vpop.f32.mrb[26].mxu1  ;;  %v463_v19 = vpop.f32.mrb[27].mxu0 }
 0x120   : > { %v612_v20 = vmax.f32 %v538_v11, 0.0  ;;  %v581_v21 = vmax.f32 %v460_v12, 0.0  ;;  %v542_v22 = vadd.f32 %v541_v18, %v1274_v25  ;;  %v464_v23 = vadd.f32 %v463_v19, %v1276_v26  ;;  %v543_v24 = vpop.f32.mrb[27].mxu1 }
 0x121   : > { %v613_v27 = vmax.f32 %v540_v16, 0.0  ;;  %v582_v28 = vmax.f32 %v462_v17, 0.0  ;;  %v544_v29 = vadd.f32 %v543_v24, %v1276_v26 }
 0x122   : > { %v1012_v30 = vpack.c.bf16 %v581_v21, %v580_v15  ;;  %v614_v31 = vmax.f32 %v542_v22, 0.0  ;;  %v583_v32 = vmax.f32 %v464_v23, 0.0 }
 0x123   : > { %v1028_v33 = vpack.c.bf16 %v613_v27, %v612_v20  ;;  %v615_v34 = vmax.f32 %v544_v29, 0.0 }
 0x124   : > { %824 = vst [vmem:[%s1289_s8 + $0x60] sm:$0xff] %v1012_v30  ;;  %v1013_v35 = vpack.c.bf16 %v583_v32, %v582_v28  ;;  %v467_v36 = vpop.f32.mrb[28].mxu0 }
 0x125   : > { %840 = vst [vmem:[%s1289_s8 + $0xe0] sm:$0xff] %v1028_v33  ;;  %v1029_v37 = vpack.c.bf16 %v615_v34, %v614_v31  ;;  %v468_v38 = vadd.f32 %v467_v36, %v1274_v25  ;;  %v547_v39 = vpop.f32.mrb[28].mxu1  ;;  %v469_v40 = vpop.f32.mrb[29].mxu0 }
 0x126   : > { %825 = vst [vmem:[%s1289_s8 + $0x68] sm:$0xff] %v1013_v35  ;;  %v548_v41 = vadd.f32 %v547_v39, %v1274_v25  ;;  %v470_v42 = vadd.f32 %v469_v40, %v1276_v26  ;;  %v549_v43 = vpop.f32.mrb[29].mxu1  ;;  %v471_v44 = vpop.f32.mrb[30].mxu0 }
 0x127   : > { %841 = vst [vmem:[%s1289_s8 + $0xe8] sm:$0xff] %v1029_v37  ;;  %v584_v45 = vmax.f32 %v468_v38, 0.0  ;;  %v550_v46 = vadd.f32 %v549_v43, %v1276_v26  ;;  %v472_v47 = vadd.f32 %v471_v44, %v1274_v25  ;;  %v551_v48 = vpop.f32.mrb[30].mxu1  ;;  %v473_v49 = vpop.f32.mrb[31].mxu0 }
 0x128   : > { %v616_v50 = vmax.f32 %v548_v41, 0.0  ;;  %v585_v51 = vmax.f32 %v470_v42, 0.0  ;;  %v552_v52 = vadd.f32 %v551_v48, %v1274_v25  ;;  %v474_v53 = vadd.f32 %v473_v49, %v1276_v26  ;;  %v553_v54 = vpop.f32.mrb[31].mxu1 }
 0x129   : > { %v617_v55 = vmax.f32 %v550_v46, 0.0  ;;  %v586_v56 = vmax.f32 %v472_v47, 0.0  ;;  %v554_v57 = vadd.f32 %v553_v54, %v1276_v26 }
 0x12a   : > { %v1014_v58 = vpack.c.bf16 %v585_v51, %v584_v45  ;;  %v618_v59 = vmax.f32 %v552_v52, 0.0  ;;  %v587_v60 = vmax.f32 %v474_v53, 0.0 }
 0x12b   : > { %v1030_v61 = vpack.c.bf16 %v617_v55, %v616_v50  ;;  %v619_v62 = vmax.f32 %v554_v57, 0.0 }
 0x12c   : > { %826 = vst [vmem:[%s1289_s8 + $0x70] sm:$0xff] %v1014_v58  ;;  %v1015_v25 = vpack.c.bf16 %v587_v60, %v586_v56 }
 0x12d   : > { %842 = vst [vmem:[%s1289_s8 + $0xf0] sm:$0xff] %v1030_v61  ;;  %v1031_v26 = vpack.c.bf16 %v619_v62, %v618_v59 }
 0x12e   : > { %827 = vst [vmem:[%s1289_s8 + $0x78] sm:$0xff] %v1015_v25 }
 0x12f   : > { %843 = vst [vmem:[%s1289_s8 + $0xf8] sm:$0xff] %v1031_v26 }
 0x130   : > { %1107 = shalt.err (!%p1104_p3)
}
 0x131   : > { %s1108_s27 = scalar_lea.hbm %s1381_s19, 4096  ;;  %s1112_s30 = scalar_lea.hbm %s1434_s3, 8192 }
 0x132   : > { %p1109_p4 = scmp.ne.s32.totalorder %s1381_s19, %s1108_s27  ;;  %p1113_p9 = scmp.lt.u32.totalorder %s1381_s19, %s1434_s3 }
 0x133   : > { %p1114_p10 = scmp.lt.u32.totalorder %s1112_s30, %s1108_s27  ;;  %p1116_p12 = scmp.lt.u32.totalorder %s1108_s27, %s1381_s19 }
 0x134   : > { %p1110_p7 = pnand %p1109_p4, %p1220_p5 }
 0x135   : > { %p1115_p11 = por %p1114_p10, %p1113_p9 }
 0x136   : > { %p1111_p8 = pneg %p1110_p7 }
 0x137   : > { %p1117_p13 = por %p1116_p12, %p1115_p11 }
 0x139   : > { %p1118_p0 = pnand %p1117_p13, %p1111_p8 }
 0x13b   : > { %1121 = shalt.err (!%p1118_p0)
}
 0x13c   : > { %s1160_s6 = smov 128   ;;  %s1161_s7 = smov 8  }
 0x13d   : > { %1036 = dma.vmem_to_hbm [thread:$0]  (%p1220_p5), %s1383_s10, 4096, %s1381_s19, %s1390_s16, %s1160_s6, %s1160_s6, %s1161_s7  }
 0x13e PF: > { %p1042_p1 = scmp.ge.s32.totalorder %s1156_s15, 2  ;;  %s874_s8 = sand.u32 1, %s1144_s12  }
 0x13f   : > { %s875_s9 = scalar_lea.sflag [#allocation3], %s874_s8 }
 0x140   : > { %p1039_p2 = pnand %p1042_p1, %p1224_p6 }
 0x142   : > { %1139 = dma.done.wait (!%p1039_p2), %s875_s9, 4096  }
 0x143   : > { %1141 = vsyncadd (!%p1039_p2), %s875_s9, 4294963200  ;;  %p13_p3 = scmp.ge.s32.totalorder %s1207_s18, 4   ;;  %s1437_s12 = smov %s1148_s13 }
 0x144   : > { %s1438_s13 = smov %s1152_s14  ;;  %s1439_s14 = smov %s1218_s21 }
 0x145   : > { %s1440_s15 = smov %s1207_s18  ;;  %15 = sbr.rel (!%p13_p3) target bundleno = 3 (0x3), region = 67 }
 0x14c   :  { %880 = vsyncpa [#allocation3], 1 }
 0x14d   :  { %882 = vsyncpa [#allocation3 + $0x1], 1 }

</bundles_post_ra>
